<compile_context>
chip_gen: v6e
topology: v6e:2x2x1
jax: 0.10.0
libtpu: 0.0.40
codegen_flags: <defaults>
</compile_context>

<pallas_src>
import functools

import jax
import jax.numpy as jnp
from jax.experimental import pallas as pl
from jax.experimental.pallas import tpu as pltpu

# ---------------- configuration (small synthetic shapes) ----------------
B = 2           # batch
T = 8           # sequence length (== block_size)
N_EMBD = 32     # n_embd
N_HEADS = 4
HEAD_SIZE = N_EMBD // N_HEADS
HIDDEN = 4 * N_EMBD
EPS = 1e-5


# ---------------------------- Pallas kernel -----------------------------
def transformer_block_kernel(
    x_ref,                         # (T, C)   (leading batch dim squeezed)
    ln1_g_ref, ln1_b_ref,          # (1, C), (1, C)
    wqkv_ref,                      # (C, 3C)  fused [Wq | Wk | Wv]
    wp_ref, bp_ref,                # (C, C), (1, C)
    ln2_g_ref, ln2_b_ref,          # (1, C), (1, C)
    w1_ref, b1_ref,                # (C, 4C), (1, 4C)
    w2_ref, b2_ref,                # (4C, C), (1, C)
    o_ref,                         # (T, C)
    *, n_heads, head_size,
):
    f32 = jnp.float32
    x = x_ref[...]
    if x.dtype != f32:             # gated cast (no-op for the f32 test path)
        x = x.astype(f32)

    # ---- hoisted parameter loads (nothing re-created inside the head loop)
    g1 = ln1_g_ref[0]
    be1 = ln1_b_ref[0]
    g2 = ln2_g_ref[0]
    be2 = ln2_b_ref[0]
    bp = bp_ref[0]
    b_ff1 = b1_ref[0]
    b_ff2 = b2_ref[0]
    wp = wp_ref[...]               # (C, C); row (sublane) slices below are cheap

    def layernorm(z, g, b):
        mu = jnp.mean(z, axis=-1, keepdims=True)
        var = jnp.mean((z - mu) ** 2, axis=-1, keepdims=True)
        return (z - mu) * jax.lax.rsqrt(var + EPS) * g + b

    C = n_heads * head_size
    scale = float(head_size) ** 0.5

    # ---- multi-headed self-attention on LN1(x) ----
    ln1 = layernorm(x, g1, be1)
    # single fused QKV matmul: (T, C) @ (C, 3C)
    qkv = jnp.dot(ln1, wqkv_ref[...], preferred_element_type=f32)   # (T, 3C)

    attn = jnp.zeros_like(x)       # f32 accumulator for the head-wise projection
    for h in range(n_heads):
        lo = h * head_size
        qh = qkv[:, lo:lo + head_size]                  # (T, D)
        kh = qkv[:, C + lo:C + lo + head_size]          # (T, D)
        vh = qkv[:, 2 * C + lo:2 * C + lo + head_size]  # (T, D)

        s = jnp.dot(qh, kh.T, preferred_element_type=f32) * scale   # (T, T)
        s = s - jnp.max(s, axis=-1, keepdims=True)
        p = jnp.exp(s)
        # EXACT normalization (approx EUP reciprocal exceeded tolerance).
        p = p / jnp.sum(p, axis=-1, keepdims=True)
        oh = jnp.dot(p, vh, preferred_element_type=f32)              # (T, D)

        # accumulate the output projection per head: sublane slice of Wp,
        # no lane-dim concatenate needed.
        attn = attn + jnp.dot(oh, wp[lo:lo + head_size, :],
                              preferred_element_type=f32)
    attn = attn + bp

    x1 = x + attn                               # first residual

    # ---- feed-forward on LN2(x1) ----
    ln2 = layernorm(x1, g2, be2)
    h1 = jnp.dot(ln2, w1_ref[...], preferred_element_type=f32) + b_ff1
    h1 = jnp.maximum(h1, 0.0)                   # ReLU
    ff = jnp.dot(h1, w2_ref[...], preferred_element_type=f32) + b_ff2

    o_ref[...] = (x1 + ff).astype(o_ref.dtype)  # second residual


# ------------------------------ wrapper ---------------------------------
def transformer_block(x, params):
    (ln1_g, ln1_b, wq, wk, wv, wp, bp, ln2_g, ln2_b, w1, b1, w2, b2) = params
    Bn, Tn, Cn = x.shape
    Hn = w1.shape[1]

    # fuse the three QKV weights into one (C, 3C) matmul operand
    wqkv = jnp.concatenate([wq, wk, wv], axis=1)

    full2d = lambda shape: pl.BlockSpec(shape, lambda b: (0, 0))

    kernel = functools.partial(
        transformer_block_kernel, n_heads=N_HEADS, head_size=HEAD_SIZE)

    return pl.pallas_call(
        kernel,
        out_shape=jax.ShapeDtypeStruct((Bn, Tn, Cn), x.dtype),
        grid_spec=pltpu.PrefetchScalarGridSpec(
            num_scalar_prefetch=0,
            grid=(Bn,),
            in_specs=[
                pl.BlockSpec((None, Tn, Cn), lambda b: (b, 0, 0)),  # x (squeezed)
                full2d((1, Cn)), full2d((1, Cn)),                   # ln1 gamma/beta
                full2d((Cn, 3 * Cn)),                               # fused Wqkv
                full2d((Cn, Cn)), full2d((1, Cn)),                  # Wp, bp
                full2d((1, Cn)), full2d((1, Cn)),                   # ln2 gamma/beta
                full2d((Cn, Hn)), full2d((1, Hn)),                  # W1, b1
                full2d((Hn, Cn)), full2d((1, Cn)),                  # W2, b2
            ],
            out_specs=pl.BlockSpec((None, Tn, Cn), lambda b: (b, 0, 0)),
        ),
        compiler_params=pltpu.CompilerParams(
            dimension_semantics=("parallel",)),
    )(x, ln1_g, ln1_b, wqkv, wp, bp, ln2_g, ln2_b, w1, b1, w2, b2)


# ------------------------ pure-JAX reference -----------------------------
def transformer_block_ref(x, params):
    (ln1_g, ln1_b, wq, wk, wv, wp, bp, ln2_g, ln2_b, w1, b1, w2, b2) = params

    def ln(z, g, b):
        mu = z.mean(-1, keepdims=True)
        var = ((z - mu) ** 2).mean(-1, keepdims=True)
        return (z - mu) / jnp.sqrt(var + EPS) * g[0] + b[0]

    z = ln(x, ln1_g, ln1_b)
    q = z @ wq
    k = z @ wk
    v = z @ wv
    qh = q.reshape(B, T, N_HEADS, HEAD_SIZE)
    kh = k.reshape(B, T, N_HEADS, HEAD_SIZE)
    vh = v.reshape(B, T, N_HEADS, HEAD_SIZE)
    scores = jnp.einsum("bthd,bshd->bhts", qh, kh) * (HEAD_SIZE ** 0.5)
    p = jax.nn.softmax(scores, axis=-1)
    attn = jnp.einsum("bhts,bshd->bthd", p, vh).reshape(B, T, N_EMBD)
    attn = attn @ wp + bp[0]
    x1 = x + attn

    z2 = ln(x1, ln2_g, ln2_b)
    ff = jnp.maximum(z2 @ w1 + b1[0], 0.0) @ w2 + b2[0]
    return x1 + ff


# ------------------------------- main ------------------------------------
if __name__ == "__main__":
    key = jax.random.PRNGKey(0)
    ks = jax.random.split(key, 16)
    scale = 0.1

    x = jax.random.normal(ks[0], (B, T, N_EMBD), dtype=jnp.float32)

    params = (
        jnp.ones((1, N_EMBD), jnp.float32),                                    # ln1 gamma
        jnp.zeros((1, N_EMBD), jnp.float32),                                   # ln1 beta
        scale * jax.random.normal(ks[1], (N_EMBD, N_EMBD), jnp.float32),       # Wq (in, out)
        scale * jax.random.normal(ks[2], (N_EMBD, N_EMBD), jnp.float32),       # Wk
        scale * jax.random.normal(ks[3], (N_EMBD, N_EMBD), jnp.float32),       # Wv
        scale * jax.random.normal(ks[4], (N_EMBD, N_EMBD), jnp.float32),       # Wp (projection)
        scale * jax.random.normal(ks[5], (1, N_EMBD), jnp.float32),            # bp
        jnp.ones((1, N_EMBD), jnp.float32),                                    # ln2 gamma
        jnp.zeros((1, N_EMBD), jnp.float32),                                   # ln2 beta
        scale * jax.random.normal(ks[6], (N_EMBD, HIDDEN), jnp.float32),       # W1
        scale * jax.random.normal(ks[7], (1, HIDDEN), jnp.float32),            # b1
        scale * jax.random.normal(ks[8], (HIDDEN, N_EMBD), jnp.float32),       # W2
        scale * jax.random.normal(ks[9], (1, N_EMBD), jnp.float32),            # b2
    )

    out = jax.block_until_ready(transformer_block(x, params))
    ref = jax.block_until_ready(transformer_block_ref(x, params))

    assert out.shape == (B, T, N_EMBD), out.shape
    err = float(jnp.max(jnp.abs(out - ref)))
    assert jnp.allclose(out, ref, atol=1e-4, rtol=1e-4), err
    print("KERNEL_OK")
</pallas_src>

<mosaic_0001>
module attributes {stable_mosaic.version = 11 : i64} {
  func.func @transformer_block_kernel(%arg0: i32, %arg1: memref<1x8x32xf32, #tpu.memory_space<vmem>>, %arg2: memref<1x32xf32, #tpu.memory_space<vmem>>, %arg3: memref<1x32xf32, #tpu.memory_space<vmem>>, %arg4: memref<32x96xf32, #tpu.memory_space<vmem>>, %arg5: memref<32x32xf32, #tpu.memory_space<vmem>>, %arg6: memref<1x32xf32, #tpu.memory_space<vmem>>, %arg7: memref<1x32xf32, #tpu.memory_space<vmem>>, %arg8: memref<1x32xf32, #tpu.memory_space<vmem>>, %arg9: memref<32x128xf32, #tpu.memory_space<vmem>>, %arg10: memref<1x128xf32, #tpu.memory_space<vmem>>, %arg11: memref<128x32xf32, #tpu.memory_space<vmem>>, %arg12: memref<1x32xf32, #tpu.memory_space<vmem>>, %arg13: memref<1x8x32xf32, #tpu.memory_space<vmem>>) attributes {dimension_semantics = [#tpu.dimension_semantics<parallel>], iteration_bounds = array<i64: 2>, scalar_prefetch = 0 : i64, scratch_operands = 0 : i64, tpu.core_type = #tpu.core_type<tc>, window_params = [{transform_indices = @transform_0, window_bounds = array<i64: 1, 8, 32>}, {pipeline_mode = #tpu.pipeline_mode<synchronous>, transform_indices = @transform_1, window_bounds = array<i64: 1, 32>}, {pipeline_mode = #tpu.pipeline_mode<synchronous>, transform_indices = @transform_2, window_bounds = array<i64: 1, 32>}, {pipeline_mode = #tpu.pipeline_mode<synchronous>, transform_indices = @transform_3, window_bounds = array<i64: 32, 96>}, {pipeline_mode = #tpu.pipeline_mode<synchronous>, transform_indices = @transform_4, window_bounds = array<i64: 32, 32>}, {pipeline_mode = #tpu.pipeline_mode<synchronous>, transform_indices = @transform_5, window_bounds = array<i64: 1, 32>}, {pipeline_mode = #tpu.pipeline_mode<synchronous>, transform_indices = @transform_6, window_bounds = array<i64: 1, 32>}, {pipeline_mode = #tpu.pipeline_mode<synchronous>, transform_indices = @transform_7, window_bounds = array<i64: 1, 32>}, {pipeline_mode = #tpu.pipeline_mode<synchronous>, transform_indices = @transform_8, window_bounds = array<i64: 32, 128>}, {pipeline_mode = #tpu.pipeline_mode<synchronous>, transform_indices = @transform_9, window_bounds = array<i64: 1, 128>}, {pipeline_mode = #tpu.pipeline_mode<synchronous>, transform_indices = @transform_10, window_bounds = array<i64: 128, 32>}, {pipeline_mode = #tpu.pipeline_mode<synchronous>, transform_indices = @transform_11, window_bounds = array<i64: 1, 32>}, {transform_indices = @transform_12, window_bounds = array<i64: 1, 8, 32>}]} {
    %c0 = arith.constant 0 : index
    %c0_0 = arith.constant 0 : index
    %c0_1 = arith.constant 0 : index
    %0 = vector.load %arg1[%c0, %c0_0, %c0_1] : memref<1x8x32xf32, #tpu.memory_space<vmem>>, vector<1x8x32xf32>
    %1 = vector.shape_cast %0 : vector<1x8x32xf32> to vector<8x32xf32>
    %c0_2 = arith.constant 0 : index
    %c0_3 = arith.constant 0 : index
    %2 = vector.load %arg2[%c0_2, %c0_3] : memref<1x32xf32, #tpu.memory_space<vmem>>, vector<1x32xf32>
    %3 = vector.shape_cast %2 : vector<1x32xf32> to vector<32xf32>
    %c0_4 = arith.constant 0 : index
    %c0_5 = arith.constant 0 : index
    %4 = vector.load %arg3[%c0_4, %c0_5] : memref<1x32xf32, #tpu.memory_space<vmem>>, vector<1x32xf32>
    %5 = vector.shape_cast %4 : vector<1x32xf32> to vector<32xf32>
    %c0_6 = arith.constant 0 : index
    %c0_7 = arith.constant 0 : index
    %6 = vector.load %arg7[%c0_6, %c0_7] : memref<1x32xf32, #tpu.memory_space<vmem>>, vector<1x32xf32>
    %7 = vector.shape_cast %6 : vector<1x32xf32> to vector<32xf32>
    %c0_8 = arith.constant 0 : index
    %c0_9 = arith.constant 0 : index
    %8 = vector.load %arg8[%c0_8, %c0_9] : memref<1x32xf32, #tpu.memory_space<vmem>>, vector<1x32xf32>
    %9 = vector.shape_cast %8 : vector<1x32xf32> to vector<32xf32>
    %c0_10 = arith.constant 0 : index
    %c0_11 = arith.constant 0 : index
    %10 = vector.load %arg6[%c0_10, %c0_11] : memref<1x32xf32, #tpu.memory_space<vmem>>, vector<1x32xf32>
    %11 = vector.shape_cast %10 : vector<1x32xf32> to vector<32xf32>
    %c0_12 = arith.constant 0 : index
    %c0_13 = arith.constant 0 : index
    %12 = vector.load %arg10[%c0_12, %c0_13] : memref<1x128xf32, #tpu.memory_space<vmem>>, vector<1x128xf32>
    %13 = vector.shape_cast %12 : vector<1x128xf32> to vector<128xf32>
    %c0_14 = arith.constant 0 : index
    %c0_15 = arith.constant 0 : index
    %14 = vector.load %arg12[%c0_14, %c0_15] : memref<1x32xf32, #tpu.memory_space<vmem>>, vector<1x32xf32>
    %15 = vector.shape_cast %14 : vector<1x32xf32> to vector<32xf32>
    %c0_16 = arith.constant 0 : index
    %c0_17 = arith.constant 0 : index
    %16 = vector.load %arg5[%c0_16, %c0_17] : memref<32x32xf32, #tpu.memory_space<vmem>>, vector<32x32xf32>
    %cst = arith.constant dense<0.000000e+00> : vector<8xf32>
    %17 = vector.multi_reduction <add>, %1, %cst [1] : vector<8x32xf32> to vector<8xf32>
    %18 = vector.shape_cast %17 : vector<8xf32> to vector<8x1xf32>
    %cst_18 = arith.constant 3.200000e+01 : f32
    %19 = vector.broadcast %cst_18 : f32 to vector<8x1xf32>
    %20 = arith.divf %18, %19 : vector<8x1xf32>
    %21 = vector.broadcast %20 : vector<8x1xf32> to vector<8x32xf32>
    %22 = arith.subf %1, %21 : vector<8x32xf32>
    %23 = arith.mulf %22, %22 : vector<8x32xf32>
    %cst_19 = arith.constant dense<0.000000e+00> : vector<8xf32>
    %24 = vector.multi_reduction <add>, %23, %cst_19 [1] : vector<8x32xf32> to vector<8xf32>
    %25 = vector.shape_cast %24 : vector<8xf32> to vector<8x1xf32>
    %cst_20 = arith.constant 3.200000e+01 : f32
    %26 = vector.broadcast %cst_20 : f32 to vector<8x1xf32>
    %27 = arith.divf %25, %26 : vector<8x1xf32>
    %28 = vector.broadcast %20 : vector<8x1xf32> to vector<8x32xf32>
    %29 = arith.subf %1, %28 : vector<8x32xf32>
    %cst_21 = arith.constant 9.99999974E-6 : f32
    %30 = vector.broadcast %cst_21 : f32 to vector<8x1xf32>
    %31 = arith.addf %27, %30 : vector<8x1xf32>
    %32 = math.rsqrt %31 : vector<8x1xf32>
    %33 = vector.broadcast %32 : vector<8x1xf32> to vector<8x32xf32>
    %34 = arith.mulf %29, %33 : vector<8x32xf32>
    %35 = vector.shape_cast %3 : vector<32xf32> to vector<1x32xf32>
    %36 = vector.broadcast %35 : vector<1x32xf32> to vector<8x32xf32>
    %37 = arith.mulf %34, %36 : vector<8x32xf32>
    %38 = vector.shape_cast %5 : vector<32xf32> to vector<1x32xf32>
    %39 = vector.broadcast %38 : vector<1x32xf32> to vector<8x32xf32>
    %40 = arith.addf %37, %39 : vector<8x32xf32>
    %c0_22 = arith.constant 0 : index
    %c0_23 = arith.constant 0 : index
    %41 = vector.load %arg4[%c0_22, %c0_23] : memref<32x96xf32, #tpu.memory_space<vmem>>, vector<32x96xf32>
    %cst_24 = arith.constant dense<0.000000e+00> : vector<8x96xf32>
    %42 = tpu.matmul %40, %41, %cst_24 {dimension_numbers = #tpu.dot_dimension_numbers<[1], [0], [0], [1], [0, 0, 1, 1], [], []>} : vector<8x32xf32>, vector<32x96xf32>, vector<8x96xf32> -> vector<8x96xf32>
    %cst_25 = arith.constant 0.000000e+00 : f32
    %43 = vector.broadcast %cst_25 : f32 to vector<8x32xf32>
    %44 = vector.extract_strided_slice %42 {offsets = [0, 0], sizes = [8, 8], strides = [1, 1]} : vector<8x96xf32> to vector<8x8xf32>
    %45 = vector.extract_strided_slice %42 {offsets = [0, 32], sizes = [8, 8], strides = [1, 1]} : vector<8x96xf32> to vector<8x8xf32>
    %46 = vector.extract_strided_slice %42 {offsets = [0, 64], sizes = [8, 8], strides = [1, 1]} : vector<8x96xf32> to vector<8x8xf32>
    %47 = tpu.transpose %45, [1, 0] : vector<8x8xf32> -> vector<8x8xf32>
    %cst_26 = arith.constant dense<0.000000e+00> : vector<8x8xf32>
    %48 = tpu.matmul %44, %47, %cst_26 {dimension_numbers = #tpu.dot_dimension_numbers<[1], [0], [0], [1], [0, 0, 1, 1], [], []>} : vector<8x8xf32>, vector<8x8xf32>, vector<8x8xf32> -> vector<8x8xf32>
    %cst_27 = arith.constant 2.82842708 : f32
    %49 = vector.broadcast %cst_27 : f32 to vector<8x8xf32>
    %50 = arith.mulf %48, %49 : vector<8x8xf32>
    %cst_28 = arith.constant dense<0xFF800000> : vector<8xf32>
    %51 = vector.multi_reduction <maximumf>, %50, %cst_28 [1] : vector<8x8xf32> to vector<8xf32>
    %52 = vector.shape_cast %51 : vector<8xf32> to vector<8x1xf32>
    %53 = vector.broadcast %52 : vector<8x1xf32> to vector<8x8xf32>
    %54 = arith.subf %50, %53 : vector<8x8xf32>
    %55 = math.exp %54 : vector<8x8xf32>
    %cst_29 = arith.constant dense<0.000000e+00> : vector<8xf32>
    %56 = vector.multi_reduction <add>, %55, %cst_29 [1] : vector<8x8xf32> to vector<8xf32>
    %57 = vector.shape_cast %56 : vector<8xf32> to vector<8x1xf32>
    %58 = vector.broadcast %57 : vector<8x1xf32> to vector<8x8xf32>
    %59 = arith.divf %55, %58 : vector<8x8xf32>
    %cst_30 = arith.constant dense<0.000000e+00> : vector<8x8xf32>
    %60 = tpu.matmul %59, %46, %cst_30 {dimension_numbers = #tpu.dot_dimension_numbers<[1], [0], [0], [1], [0, 0, 1, 1], [], []>} : vector<8x8xf32>, vector<8x8xf32>, vector<8x8xf32> -> vector<8x8xf32>
    %61 = vector.extract_strided_slice %16 {offsets = [0, 0], sizes = [8, 32], strides = [1, 1]} : vector<32x32xf32> to vector<8x32xf32>
    %cst_31 = arith.constant dense<0.000000e+00> : vector<8x32xf32>
    %62 = tpu.matmul %60, %61, %cst_31 {dimension_numbers = #tpu.dot_dimension_numbers<[1], [0], [0], [1], [0, 0, 1, 1], [], []>} : vector<8x8xf32>, vector<8x32xf32>, vector<8x32xf32> -> vector<8x32xf32>
    %63 = arith.addf %43, %62 : vector<8x32xf32>
    %64 = vector.extract_strided_slice %42 {offsets = [0, 8], sizes = [8, 8], strides = [1, 1]} : vector<8x96xf32> to vector<8x8xf32>
    %65 = vector.extract_strided_slice %42 {offsets = [0, 40], sizes = [8, 8], strides = [1, 1]} : vector<8x96xf32> to vector<8x8xf32>
    %66 = vector.extract_strided_slice %42 {offsets = [0, 72], sizes = [8, 8], strides = [1, 1]} : vector<8x96xf32> to vector<8x8xf32>
    %67 = tpu.transpose %65, [1, 0] : vector<8x8xf32> -> vector<8x8xf32>
    %cst_32 = arith.constant dense<0.000000e+00> : vector<8x8xf32>
    %68 = tpu.matmul %64, %67, %cst_32 {dimension_numbers = #tpu.dot_dimension_numbers<[1], [0], [0], [1], [0, 0, 1, 1], [], []>} : vector<8x8xf32>, vector<8x8xf32>, vector<8x8xf32> -> vector<8x8xf32>
    %cst_33 = arith.constant 2.82842708 : f32
    %69 = vector.broadcast %cst_33 : f32 to vector<8x8xf32>
    %70 = arith.mulf %68, %69 : vector<8x8xf32>
    %cst_34 = arith.constant dense<0xFF800000> : vector<8xf32>
    %71 = vector.multi_reduction <maximumf>, %70, %cst_34 [1] : vector<8x8xf32> to vector<8xf32>
    %72 = vector.shape_cast %71 : vector<8xf32> to vector<8x1xf32>
    %73 = vector.broadcast %72 : vector<8x1xf32> to vector<8x8xf32>
    %74 = arith.subf %70, %73 : vector<8x8xf32>
    %75 = math.exp %74 : vector<8x8xf32>
    %cst_35 = arith.constant dense<0.000000e+00> : vector<8xf32>
    %76 = vector.multi_reduction <add>, %75, %cst_35 [1] : vector<8x8xf32> to vector<8xf32>
    %77 = vector.shape_cast %76 : vector<8xf32> to vector<8x1xf32>
    %78 = vector.broadcast %77 : vector<8x1xf32> to vector<8x8xf32>
    %79 = arith.divf %75, %78 : vector<8x8xf32>
    %cst_36 = arith.constant dense<0.000000e+00> : vector<8x8xf32>
    %80 = tpu.matmul %79, %66, %cst_36 {dimension_numbers = #tpu.dot_dimension_numbers<[1], [0], [0], [1], [0, 0, 1, 1], [], []>} : vector<8x8xf32>, vector<8x8xf32>, vector<8x8xf32> -> vector<8x8xf32>
    %81 = vector.extract_strided_slice %16 {offsets = [8, 0], sizes = [8, 32], strides = [1, 1]} : vector<32x32xf32> to vector<8x32xf32>
    %cst_37 = arith.constant dense<0.000000e+00> : vector<8x32xf32>
    %82 = tpu.matmul %80, %81, %cst_37 {dimension_numbers = #tpu.dot_dimension_numbers<[1], [0], [0], [1], [0, 0, 1, 1], [], []>} : vector<8x8xf32>, vector<8x32xf32>, vector<8x32xf32> -> vector<8x32xf32>
    %83 = arith.addf %63, %82 : vector<8x32xf32>
    %84 = vector.extract_strided_slice %42 {offsets = [0, 16], sizes = [8, 8], strides = [1, 1]} : vector<8x96xf32> to vector<8x8xf32>
    %85 = vector.extract_strided_slice %42 {offsets = [0, 48], sizes = [8, 8], strides = [1, 1]} : vector<8x96xf32> to vector<8x8xf32>
    %86 = vector.extract_strided_slice %42 {offsets = [0, 80], sizes = [8, 8], strides = [1, 1]} : vector<8x96xf32> to vector<8x8xf32>
    %87 = tpu.transpose %85, [1, 0] : vector<8x8xf32> -> vector<8x8xf32>
    %cst_38 = arith.constant dense<0.000000e+00> : vector<8x8xf32>
    %88 = tpu.matmul %84, %87, %cst_38 {dimension_numbers = #tpu.dot_dimension_numbers<[1], [0], [0], [1], [0, 0, 1, 1], [], []>} : vector<8x8xf32>, vector<8x8xf32>, vector<8x8xf32> -> vector<8x8xf32>
    %cst_39 = arith.constant 2.82842708 : f32
    %89 = vector.broadcast %cst_39 : f32 to vector<8x8xf32>
    %90 = arith.mulf %88, %89 : vector<8x8xf32>
    %cst_40 = arith.constant dense<0xFF800000> : vector<8xf32>
    %91 = vector.multi_reduction <maximumf>, %90, %cst_40 [1] : vector<8x8xf32> to vector<8xf32>
    %92 = vector.shape_cast %91 : vector<8xf32> to vector<8x1xf32>
    %93 = vector.broadcast %92 : vector<8x1xf32> to vector<8x8xf32>
    %94 = arith.subf %90, %93 : vector<8x8xf32>
    %95 = math.exp %94 : vector<8x8xf32>
    %cst_41 = arith.constant dense<0.000000e+00> : vector<8xf32>
    %96 = vector.multi_reduction <add>, %95, %cst_41 [1] : vector<8x8xf32> to vector<8xf32>
    %97 = vector.shape_cast %96 : vector<8xf32> to vector<8x1xf32>
    %98 = vector.broadcast %97 : vector<8x1xf32> to vector<8x8xf32>
    %99 = arith.divf %95, %98 : vector<8x8xf32>
    %cst_42 = arith.constant dense<0.000000e+00> : vector<8x8xf32>
    %100 = tpu.matmul %99, %86, %cst_42 {dimension_numbers = #tpu.dot_dimension_numbers<[1], [0], [0], [1], [0, 0, 1, 1], [], []>} : vector<8x8xf32>, vector<8x8xf32>, vector<8x8xf32> -> vector<8x8xf32>
    %101 = vector.extract_strided_slice %16 {offsets = [16, 0], sizes = [8, 32], strides = [1, 1]} : vector<32x32xf32> to vector<8x32xf32>
    %cst_43 = arith.constant dense<0.000000e+00> : vector<8x32xf32>
    %102 = tpu.matmul %100, %101, %cst_43 {dimension_numbers = #tpu.dot_dimension_numbers<[1], [0], [0], [1], [0, 0, 1, 1], [], []>} : vector<8x8xf32>, vector<8x32xf32>, vector<8x32xf32> -> vector<8x32xf32>
    %103 = arith.addf %83, %102 : vector<8x32xf32>
    %104 = vector.extract_strided_slice %42 {offsets = [0, 24], sizes = [8, 8], strides = [1, 1]} : vector<8x96xf32> to vector<8x8xf32>
    %105 = vector.extract_strided_slice %42 {offsets = [0, 56], sizes = [8, 8], strides = [1, 1]} : vector<8x96xf32> to vector<8x8xf32>
    %106 = vector.extract_strided_slice %42 {offsets = [0, 88], sizes = [8, 8], strides = [1, 1]} : vector<8x96xf32> to vector<8x8xf32>
    %107 = tpu.transpose %105, [1, 0] : vector<8x8xf32> -> vector<8x8xf32>
    %cst_44 = arith.constant dense<0.000000e+00> : vector<8x8xf32>
    %108 = tpu.matmul %104, %107, %cst_44 {dimension_numbers = #tpu.dot_dimension_numbers<[1], [0], [0], [1], [0, 0, 1, 1], [], []>} : vector<8x8xf32>, vector<8x8xf32>, vector<8x8xf32> -> vector<8x8xf32>
    %cst_45 = arith.constant 2.82842708 : f32
    %109 = vector.broadcast %cst_45 : f32 to vector<8x8xf32>
    %110 = arith.mulf %108, %109 : vector<8x8xf32>
    %cst_46 = arith.constant dense<0xFF800000> : vector<8xf32>
    %111 = vector.multi_reduction <maximumf>, %110, %cst_46 [1] : vector<8x8xf32> to vector<8xf32>
    %112 = vector.shape_cast %111 : vector<8xf32> to vector<8x1xf32>
    %113 = vector.broadcast %112 : vector<8x1xf32> to vector<8x8xf32>
    %114 = arith.subf %110, %113 : vector<8x8xf32>
    %115 = math.exp %114 : vector<8x8xf32>
    %cst_47 = arith.constant dense<0.000000e+00> : vector<8xf32>
    %116 = vector.multi_reduction <add>, %115, %cst_47 [1] : vector<8x8xf32> to vector<8xf32>
    %117 = vector.shape_cast %116 : vector<8xf32> to vector<8x1xf32>
    %118 = vector.broadcast %117 : vector<8x1xf32> to vector<8x8xf32>
    %119 = arith.divf %115, %118 : vector<8x8xf32>
    %cst_48 = arith.constant dense<0.000000e+00> : vector<8x8xf32>
    %120 = tpu.matmul %119, %106, %cst_48 {dimension_numbers = #tpu.dot_dimension_numbers<[1], [0], [0], [1], [0, 0, 1, 1], [], []>} : vector<8x8xf32>, vector<8x8xf32>, vector<8x8xf32> -> vector<8x8xf32>
    %121 = vector.extract_strided_slice %16 {offsets = [24, 0], sizes = [8, 32], strides = [1, 1]} : vector<32x32xf32> to vector<8x32xf32>
    %cst_49 = arith.constant dense<0.000000e+00> : vector<8x32xf32>
    %122 = tpu.matmul %120, %121, %cst_49 {dimension_numbers = #tpu.dot_dimension_numbers<[1], [0], [0], [1], [0, 0, 1, 1], [], []>} : vector<8x8xf32>, vector<8x32xf32>, vector<8x32xf32> -> vector<8x32xf32>
    %123 = arith.addf %103, %122 : vector<8x32xf32>
    %124 = vector.shape_cast %11 : vector<32xf32> to vector<1x32xf32>
    %125 = vector.broadcast %124 : vector<1x32xf32> to vector<8x32xf32>
    %126 = arith.addf %123, %125 : vector<8x32xf32>
    %127 = arith.addf %1, %126 : vector<8x32xf32>
    %cst_50 = arith.constant dense<0.000000e+00> : vector<8xf32>
    %128 = vector.multi_reduction <add>, %127, %cst_50 [1] : vector<8x32xf32> to vector<8xf32>
    %129 = vector.shape_cast %128 : vector<8xf32> to vector<8x1xf32>
    %cst_51 = arith.constant 3.200000e+01 : f32
    %130 = vector.broadcast %cst_51 : f32 to vector<8x1xf32>
    %131 = arith.divf %129, %130 : vector<8x1xf32>
    %132 = vector.broadcast %131 : vector<8x1xf32> to vector<8x32xf32>
    %133 = arith.subf %127, %132 : vector<8x32xf32>
    %134 = arith.mulf %133, %133 : vector<8x32xf32>
    %cst_52 = arith.constant dense<0.000000e+00> : vector<8xf32>
    %135 = vector.multi_reduction <add>, %134, %cst_52 [1] : vector<8x32xf32> to vector<8xf32>
    %136 = vector.shape_cast %135 : vector<8xf32> to vector<8x1xf32>
    %cst_53 = arith.constant 3.200000e+01 : f32
    %137 = vector.broadcast %cst_53 : f32 to vector<8x1xf32>
    %138 = arith.divf %136, %137 : vector<8x1xf32>
    %139 = vector.broadcast %131 : vector<8x1xf32> to vector<8x32xf32>
    %140 = arith.subf %127, %139 : vector<8x32xf32>
    %cst_54 = arith.constant 9.99999974E-6 : f32
    %141 = vector.broadcast %cst_54 : f32 to vector<8x1xf32>
    %142 = arith.addf %138, %141 : vector<8x1xf32>
    %143 = math.rsqrt %142 : vector<8x1xf32>
    %144 = vector.broadcast %143 : vector<8x1xf32> to vector<8x32xf32>
    %145 = arith.mulf %140, %144 : vector<8x32xf32>
    %146 = vector.shape_cast %7 : vector<32xf32> to vector<1x32xf32>
    %147 = vector.broadcast %146 : vector<1x32xf32> to vector<8x32xf32>
    %148 = arith.mulf %145, %147 : vector<8x32xf32>
    %149 = vector.shape_cast %9 : vector<32xf32> to vector<1x32xf32>
    %150 = vector.broadcast %149 : vector<1x32xf32> to vector<8x32xf32>
    %151 = arith.addf %148, %150 : vector<8x32xf32>
    %c0_55 = arith.constant 0 : index
    %c0_56 = arith.constant 0 : index
    %152 = vector.load %arg9[%c0_55, %c0_56] : memref<32x128xf32, #tpu.memory_space<vmem>>, vector<32x128xf32>
    %cst_57 = arith.constant dense<0.000000e+00> : vector<8x128xf32>
    %153 = tpu.matmul %151, %152, %cst_57 {dimension_numbers = #tpu.dot_dimension_numbers<[1], [0], [0], [1], [0, 0, 1, 1], [], []>} : vector<8x32xf32>, vector<32x128xf32>, vector<8x128xf32> -> vector<8x128xf32>
    %154 = vector.shape_cast %13 : vector<128xf32> to vector<1x128xf32>
    %155 = vector.broadcast %154 : vector<1x128xf32> to vector<8x128xf32>
    %156 = arith.addf %153, %155 : vector<8x128xf32>
    %cst_58 = arith.constant 0.000000e+00 : f32
    %157 = vector.broadcast %cst_58 : f32 to vector<8x128xf32>
    %158 = arith.maximumf %156, %157 : vector<8x128xf32>
    %c0_59 = arith.constant 0 : index
    %c0_60 = arith.constant 0 : index
    %159 = vector.load %arg11[%c0_59, %c0_60] : memref<128x32xf32, #tpu.memory_space<vmem>>, vector<128x32xf32>
    %cst_61 = arith.constant dense<0.000000e+00> : vector<8x32xf32>
    %160 = tpu.matmul %158, %159, %cst_61 {dimension_numbers = #tpu.dot_dimension_numbers<[1], [0], [0], [1], [0, 0, 1, 1], [], []>} : vector<8x128xf32>, vector<128x32xf32>, vector<8x32xf32> -> vector<8x32xf32>
    %161 = vector.shape_cast %15 : vector<32xf32> to vector<1x32xf32>
    %162 = vector.broadcast %161 : vector<1x32xf32> to vector<8x32xf32>
    %163 = arith.addf %160, %162 : vector<8x32xf32>
    %164 = arith.addf %127, %163 : vector<8x32xf32>
    %c0_62 = arith.constant 0 : index
    %c0_63 = arith.constant 0 : index
    %c0_64 = arith.constant 0 : index
    %165 = vector.load %arg13[%c0_62, %c0_63, %c0_64] : memref<1x8x32xf32, #tpu.memory_space<vmem>>, vector<1x8x32xf32>
    %166 = vector.shape_cast %165 : vector<1x8x32xf32> to vector<8x32xf32>
    %167 = vector.shape_cast %164 : vector<8x32xf32> to vector<1x8x32xf32>
    tpu.vector_store %arg13[%c0_62, %c0_63, %c0_64], %167 {strides = array<i32>} : memref<1x8x32xf32, #tpu.memory_space<vmem>>, vector<1x8x32xf32>,
    return
  }
  func.func @transform_0(%arg0: i32) -> (i32, i32, i32) {
    %c0_i32 = arith.constant 0 : i32
    %c0_i32_0 = arith.constant 0 : i32
    %c0_i32_1 = arith.constant 0 : i32
    return %arg0, %c0_i32, %c0_i32_0 : i32, i32, i32
  }
  func.func @transform_1(%arg0: i32) -> (i32, i32) {
    %c0_i32 = arith.constant 0 : i32
    %c0_i32_0 = arith.constant 0 : i32
    %c0_i32_1 = arith.constant 0 : i32
    return %c0_i32, %c0_i32_0 : i32, i32
  }
  func.func @transform_2(%arg0: i32) -> (i32, i32) {
    %c0_i32 = arith.constant 0 : i32
    %c0_i32_0 = arith.constant 0 : i32
    %c0_i32_1 = arith.constant 0 : i32
    return %c0_i32, %c0_i32_0 : i32, i32
  }
  func.func @transform_3(%arg0: i32) -> (i32, i32) {
    %c0_i32 = arith.constant 0 : i32
    %c0_i32_0 = arith.constant 0 : i32
    %c0_i32_1 = arith.constant 0 : i32
    return %c0_i32, %c0_i32_0 : i32, i32
  }
  func.func @transform_4(%arg0: i32) -> (i32, i32) {
    %c0_i32 = arith.constant 0 : i32
    %c0_i32_0 = arith.constant 0 : i32
    %c0_i32_1 = arith.constant 0 : i32
    return %c0_i32, %c0_i32_0 : i32, i32
  }
  func.func @transform_5(%arg0: i32) -> (i32, i32) {
    %c0_i32 = arith.constant 0 : i32
    %c0_i32_0 = arith.constant 0 : i32
    %c0_i32_1 = arith.constant 0 : i32
    return %c0_i32, %c0_i32_0 : i32, i32
  }
  func.func @transform_6(%arg0: i32) -> (i32, i32) {
    %c0_i32 = arith.constant 0 : i32
    %c0_i32_0 = arith.constant 0 : i32
    %c0_i32_1 = arith.constant 0 : i32
    return %c0_i32, %c0_i32_0 : i32, i32
  }
  func.func @transform_7(%arg0: i32) -> (i32, i32) {
    %c0_i32 = arith.constant 0 : i32
    %c0_i32_0 = arith.constant 0 : i32
    %c0_i32_1 = arith.constant 0 : i32
    return %c0_i32, %c0_i32_0 : i32, i32
  }
  func.func @transform_8(%arg0: i32) -> (i32, i32) {
    %c0_i32 = arith.constant 0 : i32
    %c0_i32_0 = arith.constant 0 : i32
    %c0_i32_1 = arith.constant 0 : i32
    return %c0_i32, %c0_i32_0 : i32, i32
  }
  func.func @transform_9(%arg0: i32) -> (i32, i32) {
    %c0_i32 = arith.constant 0 : i32
    %c0_i32_0 = arith.constant 0 : i32
    %c0_i32_1 = arith.constant 0 : i32
    return %c0_i32, %c0_i32_0 : i32, i32
  }
  func.func @transform_10(%arg0: i32) -> (i32, i32) {
    %c0_i32 = arith.constant 0 : i32
    %c0_i32_0 = arith.constant 0 : i32
    %c0_i32_1 = arith.constant 0 : i32
    return %c0_i32, %c0_i32_0 : i32, i32
  }
  func.func @transform_11(%arg0: i32) -> (i32, i32) {
    %c0_i32 = arith.constant 0 : i32
    %c0_i32_0 = arith.constant 0 : i32
    %c0_i32_1 = arith.constant 0 : i32
    return %c0_i32, %c0_i32_0 : i32, i32
  }
  func.func @transform_12(%arg0: i32) -> (i32, i32, i32) {
    %c0_i32 = arith.constant 0 : i32
    %c0_i32_0 = arith.constant 0 : i32
    %c0_i32_1 = arith.constant 0 : i32
    return %arg0, %c0_i32, %c0_i32_0 : i32, i32, i32
  }
}

</mosaic_0001>

<bundles_post_ra>
// kernel: tpu_custom_call.1
= control target key start
LH: loop header
LB: loop body
LE: loop exit
PB: predicated region body
PF: predicated region fallthrough
CT: control target
= control target key end

     0   :  { %s2503_s0 = inlined_call_operand.vmem [shape: f32[2,8,32], index: 0, kind: input, shape index: {}]   ;;  %s2504_s1 = inlined_call_operand.vmem [shape: f32[1,32], index: 1, kind: input, shape index: {}]   ;;  %s2505_s2 = inlined_call_operand.vmem [shape: f32[1,32], index: 2, kind: input, shape index: {}]   ;;  %s2506_s3 = inlined_call_operand.vmem [shape: f32[32,96], index: 3, kind: input, shape index: {}]   ;;  %s2507_s4 = inlined_call_operand.vmem [shape: f32[32,32], index: 4, kind: input, shape index: {}]   ;;  %s2508_s5 = inlined_call_operand.vmem [shape: f32[1,32], index: 5, kind: input, shape index: {}]   ;;  %s2509_s6 = inlined_call_operand.vmem [shape: f32[1,32], index: 6, kind: input, shape index: {}]   ;;  %s2510_s7 = inlined_call_operand.vmem [shape: f32[1,32], index: 7, kind: input, shape index: {}]   ;;  %s2511_s8 = inlined_call_operand.vmem [shape: f32[32,128], index: 8, kind: input, shape index: {}]   ;;  %s2512_s9 = inlined_call_operand.vmem [shape: f32[1,128], index: 9, kind: input, shape index: {}]   ;;  %s2513_s10 = inlined_call_operand.vmem [shape: f32[128,32], index: 10, kind: input, shape index: {}]   ;;  %s2514_s11 = inlined_call_operand.vmem [shape: f32[1,32], index: 11, kind: input, shape index: {}]   ;;  %s2515_s12 = inlined_call_operand.hbm [shape: f32[2,8,32], index: 12, kind: output, shape index: {}]  }
   0x1   :  { %2516 = sst [smem:[#allocation5_spill]] %s2503_s0 }
   0x2   :  { %2517 = sst [smem:[#allocation6_spill]] %s2504_s1 }
   0x3   :  { %2518 = sst [smem:[#allocation7_spill]] %s2505_s2 }
   0x4   :  { %17 = vsyncpa [#allocation3], 0 }
   0x5   :  { %19 = vsyncpa [#allocation3 + $0x1], 0  ;;  %s2187_s21 = smov 0   ;;  %s2189_s22 = smov 0  }
   0x6   :  { %s2191_s23 = smov 0   ;;  %s2193_s24 = smov 0  }
   0x7 LB: > { %s2208_s25 = sadd.s32 4294967295, %s2106_s24   ;;  %s1771_s26 = sadd.s32 4294967294, %s2106_s24   ;;  %s2106_s24 = sphi %s2193_s24, %s2527_s24   ;;  %s2102_s23 = sphi %s2191_s23, %s2526_s23   ;;  %s2098_s22 = sphi %s2189_s22, %s2525_s22   ;;  %s2094_s21 = sphi %s2187_s21, %s2524_s21  }
   0x8   : > { %s2212_s27 = sadd.s32 1, %s2106_s24   ;;  %s289_s28 = sadd.s32 1, %s2102_s23 }
   0x9   : > { %s286_s29 = ssub.s32 %s2106_s24, %s2212_s27  ;;  %p299_p0 = scmp.ne.s32.totalorder %s2102_s23, %s2098_s22 }
   0xa   : > { %p287_p1 = scmp.eq.s32.totalorder %s286_s29, 0  ;;  %p300_p2 = scmp.eq.s32.totalorder %s2208_s25, 1 }
   0xb   : > { %p305_p3 = scmp.ne.s32.totalorder %s2098_s22, %s2094_s21  ;;  %p306_p4 = scmp.eq.s32.totalorder %s1771_s26, 1 }
   0xc   : > { %s2223_s30 = scalar_select %p287_p1, %s2102_s23, %s289_s28  }
   0xd   : > { %p2225_p5 = por %p300_p2, %p299_p0  ;;  %p2229_p6 = por %p306_p4, %p305_p3 }
   0xe   : > { %p1774_p7 = scmp.ge.s32.totalorder %s2106_s24, 1  ;;  %p364_p8 = scmp.lt.s32.totalorder %s2106_s24, 3 }
  0x10   : > { %p365_p9 = pnand %p1774_p7, %p364_p8 }
  0x11   : > { %p405_p10 = scmp.lt.s32.totalorder (!%p365_p9), %s2208_s25, 1  ;;  %s2521_s0 = sld [smem:[#allocation5_spill]] (!%p365_p9) }
  0x12   : > { %368 = sbr.rel (%p365_p9) target bundleno = 3987 (0xf93), region = 68  ;;  %s2522_s1 = sld [smem:[#allocation6_spill]] (!%p365_p9) }
  0x13   : > { %s2523_s2 = sld [smem:[#allocation7_spill]] (!%p365_p9)  ;;  %s2110_s29 = smov (!%p365_p9), 64  }
  0x14   : > { %s2113_s17 = smov (!%p365_p9), 120   ;;  %s2114_s20 = smov (!%p365_p9), 56  }
  0x15   : > { %s2115_s26 = smov (!%p365_p9), 80   ;;  %s2116_s28 = smov (!%p365_p9), 112  }
  0x16   : > { %s2119_s18 = smov (!%p365_p9), 104  }
  0x17   : > { %s406_s15 = scalar_select %p405_p10, %s2208_s25, 1  ;;  %vm421_vm0 = vcmask 261120   ;;  %v453_v7 = vld [vmem:[%s2506_s3 + $0x18] sm:$0xff]  ;;  %v2108_v8 = vmov 0.0   ;;  %v452_v9 = vld [vmem:[%s2506_s3 + $0x10] sm:$0xff]  ;;  %vm2109_vm1 = vmmov 0  }
  0x18   : > { %1857 = vmatprep.subr.mxu0 %v2108_v8  ;;  %1865 = vmatprep.mubr.msk.f32.mxu0 %vm2109_vm1, %v2108_v8  ;;  %v451_v10 = vld [vmem:[%s2506_s3 + $0x8] sm:$0xff]  ;;  %v450_v11 = vld [vmem:[%s2506_s3] sm:$0xff]  ;;  %vm530_vm2 = vcmask 64512  }
  0x19   : > { %s1776_s16 = sshll.u32 %s406_s15, 3  ;;  %1858 = vmatpush3.msra.mxu0 %v453_v7  ;;  %1893 = vmatprep.subr.mxu1 %v2108_v8  ;;  %v1777_v16 = vld [vmem:[%s2522_s1] ss:$0 sm:$0xff]  ;;  %s2111_s15 = smov 96   ;;  %v418_v58 = vld [vmem:[%s2507_s4 + $0x8] sm:$0xff] }
  0x1a   : > { %s408_s19 = scalar_lea.vmem %s2521_s0, %s1776_s16  ;;  %1859 = vmatprep.subr.mxu0 %v2108_v8  ;;  %1895 = vmatprep.mubr.msk.f32.mxu1 %vm2109_vm1, %v2108_v8  ;;  %v1778_v18 = vld [vmem:[%s2523_s2] ss:$0 sm:$0xff]  ;;  %s2112_s16 = smov 88  }
  0x1b   : > { %v2240_v0 = vld [vmem:[%s408_s19] sm:$0xff]  ;;  %1860 = vmatpush3.msra.mxu0 %v452_v9 }
  0x1c   : > { %v422_v1 = vsel %vm421_vm0, %v2240_v0, 0.0  ;;  %1861 = vmatprep.subr.mxu0 %v2108_v8  ;;  %v417_v39 = vld [vmem:[%s2507_s4] sm:$0xff] }
  0x1d   : > { %423 = vadd.xlane.f32.xlu0 %v422_v1  ;;  %1862 = vmatpush3.msra.mxu0 %v451_v10 }
  0x1e   : > { %1863 = vmatprep.subr.mxu0 %v2108_v8  ;;  %1894 = vmatpush3.msra.mxu1 %v417_v39 }
  0x1f   : > { %1864 = vmatpush3.msra.mxu0 %v450_v11  ;;  %1903 = vmatprep.subr.mxu1 %v2108_v8 }
  0x20   : > { %1868 = vmatprep.subr.mxu0 %v2108_v8 }
  0xa6   : > { %v424_v2 = vpop.xlane.xlu0 %423 }
  0xa7   : > { %v426_v3 = vmul.f32 0.03125, %v424_v2 }
  0xa9   : > { %v427_v4 = vsub.f32 %v2240_v0, %v426_v3 }
  0xab   : > { %v428_v5 = vmul.f32 %v427_v4, %v427_v4 }
  0xad   : > { %v429_v6 = vsel %vm421_vm0, %v428_v5, 0.0 }
  0xae   : > { %430 = vadd.xlane.f32.xlu0 %v429_v6 }
 0x137   : > { %v431_v12 = vpop.xlane.xlu0 %430 }
 0x138   : > { %v432_v13 = vmul.f32 0.03125, %v431_v12 }
 0x13a   : > { %v433_v14 = vadd.f32 1e-05, %v432_v13 }
 0x13c   : > { %2026 = vrsqrt.f32 %v433_v14 }
 0x149   : > { %v2027_v15 = vpop.eup %2026 }
 0x14a   : > { %v435_v17 = vmul.f32 %v2027_v15, %v427_v4 }
 0x14c   : > { %v442_v19 = vmul.f32 %v1777_v16, %v435_v17  ;;  %v419_v17 = vld [vmem:[%s2507_s4 + $0x10] sm:$0xff] }
 0x14e   : > { %v449_v20 = vadd.f32 %v1778_v18, %v442_v19 }
 0x150   : > { %1866 = vmatmul.mubr.msk.f32.vlgmr.msra.gmra.mxu0 %vm421_vm0, %v449_v20 }
 0x151   : > { %1870 = vmatprep.mubr.msk.f32.mxu0 %vm2109_vm1, %v2108_v8 }
 0x210   : > { %v2277_v21 = vpop.f32.mrf.mxu0 }
 0x211   : > { %617 = vrot.lane.b32.xlu0 %v2277_v21, %s2110_s29  ;;  %528 = vrot.lane.b32.xlu1 %v2277_v21, %s2111_s15  ;;  %s2117_s29 = smov 48  }
 0x212   : > { %v1867_v22 = vpop.f32.mrf.mxu0 }
 0x283   : > { %v529_v23 = vpop.permute.xlu1 %528  ;;  %v618_v24 = vpop.permute.xlu0 %617 }
 0x284   : > { %1869 = vmatpush3.xpose.msk.msra.mxu0 %vm530_vm2, %v529_v23 }
 0x285   : > { %1873 = vmatprep.subr.mxu0 %v2108_v8 }
 0x287   : > { %1871 = vmatmul.mubr.msk.f32.vlgmr.msra.gmra.mxu0 %vm530_vm2, %v2277_v21 }
 0x288   : > { %1874 = vmatpush3.msra.mxu0 %v618_v24  ;;  %1875 = vmatprep.mubr.msk.f32.mxu0 %vm2109_vm1, %v2108_v8 }
 0x289   : > { %1878 = vmatprep.subr.mxu0 %v2108_v8 }
 0x347   : > { %v601_v25 = vpop.f32.mrf.mxu0 }
 0x348   : > { %v605_v26 = vmul.f32 2.828427, %v601_v25 }
 0x349   : > { %v1872_v27 = vpop.f32.mrf.mxu0 }
 0x34a   : > { %v606_v28 = vsel %vm530_vm2, %v605_v26, -inf }
 0x34b   : > { %607 = vmax.xlane.f32.xlu1 %v606_v28 }
 0x3d4   : > { %v608_v29 = vpop.xlane.xlu1 %607 }
 0x3d5   : > { %v609_v30 = vsub.f32 %v605_v26, %v608_v29 }
 0x3d7   : > { %v610_v31 = vmul.f32 1.442695, %v609_v30 }
 0x3d9   : > { %2028 = vpow2.f32 %v610_v31  ;;  %v420_v31 = vld [vmem:[%s2507_s4 + $0x18] sm:$0xff] }
 0x3e6   : > { %v2029_v32 = vpop.eup %2028 }
 0x3e7   : > { %v612_v33 = vsel %vm530_vm2, %v2029_v32, 0.0 }
 0x3e8   : > { %613 = vadd.xlane.f32.xlu0 %v612_v33 }
 0x3fe   : > { %695 = vrot.lane.b32.xlu0 %v2277_v21, %s2112_s16 }
 0x402   : > { %693 = vrot.lane.b32.xlu0 %v2277_v21, %s2113_s17  ;;  %s2118_s17 = smov 72  }
 0x471   : > { %v614_v34 = vpop.xlane.xlu0 %613 }
 0x472   : > { %2030 = vrcp.f32 %v614_v34 }
 0x475   : > { %v696_v36 = vpop.permute.xlu0 %695 }
 0x479   : > { %v694_v38 = vpop.permute.xlu0 %693 }
 0x47f   : > { %v2031_v35 = vpop.eup %2030 }
 0x480   : > { %v616_v37 = vmul.f32 %v2031_v35, %v2029_v32 }
 0x482   : > { %1876 = vmatmul.mubr.msk.f32.vlgmr.msra.gmra.mxu0 %vm530_vm2, %v616_v37 }
 0x483   : > { %1879 = vmatpush3.xpose.msk.msra.mxu0 %vm530_vm2, %v696_v36  ;;  %1880 = vmatprep.mubr.msk.f32.mxu0 %vm2109_vm1, %v2108_v8 }
 0x484   : > { %1883 = vmatprep.subr.mxu0 %v2108_v8 }
 0x486   : > { %1881 = vmatmul.mubr.msk.f32.vlgmr.msra.gmra.mxu0 %vm530_vm2, %v694_v38 }
 0x487   : > { %1885 = vmatprep.mubr.msk.f32.mxu0 %vm2109_vm1, %v2108_v8 }
 0x542   : > { %v689_v40 = vpop.f32.mrf.mxu0 }
 0x543   : > { %1896 = vmatmul.mubr.msk.f32.vlgmr.msra.gmra.mxu1 %vm530_vm2, %v689_v40  ;;  %v1796_v40 = vld [vmem:[%s2508_s5] ss:$0 sm:$0xff] }
 0x544   : > { %v1877_v41 = vpop.f32.mrf.mxu0  ;;  %1905 = vmatprep.mubr.msk.f32.mxu1 %vm2109_vm1, %v2108_v8 }
 0x546   : > { %v767_v42 = vpop.f32.mrf.mxu0 }
 0x547   : > { %v771_v43 = vmul.f32 2.828427, %v767_v42 }
 0x548   : > { %v1882_v44 = vpop.f32.mrf.mxu0 }
 0x549   : > { %v772_v45 = vsel %vm530_vm2, %v771_v43, -inf }
 0x54a   : > { %773 = vmax.xlane.f32.xlu1 %v772_v45 }
 0x55b   : > { %783 = vrot.lane.b32.xlu1 %v2277_v21, %s2114_s20 }
 0x55f   : > { %1007 = vrot.lane.b32.xlu1 %v2277_v21, %s2115_s26  ;;  %s2120_s26 = smov 40  }
 0x563   : > { %1005 = vrot.lane.b32.xlu1 %v2277_v21, %s2116_s28  ;;  %s1803_s28 = sshll.u32 %s2208_s25, 7  ;;  %s2121_s25 = smov [#allocation2]  }
 0x564   : > { %s1710_s0 = scalar_lea.hbm %s2515_s12, %s1803_s28 }
 0x5d3   : > { %v774_v46 = vpop.xlane.xlu1 %773 }
 0x5d4   : > { %v775_v47 = vsub.f32 %v771_v43, %v774_v46 }
 0x5d6   : > { %v776_v48 = vmul.f32 1.442695, %v775_v47 }
 0x5d7   : > { %v784_v49 = vpop.permute.xlu1 %783 }
 0x5d8   : > { %2032 = vpow2.f32 %v776_v48  ;;  %1884 = vmatpush3.msra.mxu0 %v784_v49 }
 0x5d9   : > { %1888 = vmatprep.subr.mxu0 %v2108_v8 }
 0x5db   : > { %v1008_v59 = vpop.permute.xlu1 %1007 }
 0x5df   : > { %v1006_v62 = vpop.permute.xlu1 %1005 }
 0x5e5   : > { %v2033_v50 = vpop.eup %2032 }
 0x5e6   : > { %v778_v51 = vsel %vm530_vm2, %v2033_v50, 0.0 }
 0x5e7   : > { %779 = vadd.xlane.f32.xlu0 %v778_v51 }
 0x5fd   : > { %1095 = vrot.lane.b32.xlu0 %v2277_v21, %s2117_s29 }
 0x603   : > { %v2314_v52 = vpop.f32.mrf.mxu1 }
 0x605   : > { %v1897_v53 = vpop.f32.mrf.mxu1 }
 0x606   : > { %v1521_v53 = vld [vmem:[%s2511_s8 + $0x8] sm:$0xff] }
 0x670   : > { %v780_v54 = vpop.xlane.xlu0 %779 }
 0x671   : > { %2034 = vrcp.f32 %v780_v54  ;;  %v1520_v54 = vld [vmem:[%s2511_s8] sm:$0xff] }
 0x674   : > { %v1096_v55 = vpop.permute.xlu0 %1095 }
 0x675   : > { %1904 = vmatpush3.msra.mxu1 %v1096_v55  ;;  %v1619_v55 = vld [vmem:[%s2513_s10 + $0x78] sm:$0xff] }
 0x676   : > { %1913 = vmatprep.subr.mxu1 %v2108_v8 }
 0x67e   : > { %v2035_v56 = vpop.eup %2034 }
 0x67f   : > { %v782_v57 = vmul.f32 %v2035_v56, %v2033_v50  ;;  %v1618_v56 = vld [vmem:[%s2513_s10 + $0x70] sm:$0xff] }
 0x681   : > { %1886 = vmatmul.mubr.msk.f32.vlgmr.msra.gmra.mxu0 %vm530_vm2, %v782_v57  ;;  %v1617_v57 = vld [vmem:[%s2513_s10 + $0x68] sm:$0xff] }
 0x682   : > { %1889 = vmatpush3.msra.mxu0 %v418_v58  ;;  %1890 = vmatprep.mubr.msk.f32.mxu0 %vm2109_vm1, %v2108_v8  ;;  %v1616_v58 = vld [vmem:[%s2513_s10 + $0x60] sm:$0xff] }
 0x683   : > { %1898 = vmatprep.subr.mxu0 %v2108_v8 }
 0x741   : > { %v855_v60 = vpop.f32.mrf.mxu0 }
 0x742   : > { %1891 = vmatmul.mubr.msk.f32.vlgmr.msra.gmra.mxu0 %vm530_vm2, %v855_v60  ;;  %v1614_v60 = vld [vmem:[%s2513_s10 + $0x50] sm:$0xff] }
 0x743   : > { %1899 = vmatpush3.xpose.msk.msra.mxu0 %vm530_vm2, %v1008_v59  ;;  %v1887_v61 = vpop.f32.mrf.mxu0  ;;  %1900 = vmatprep.mubr.msk.f32.mxu0 %vm2109_vm1, %v2108_v8  ;;  %v1615_v59 = vld [vmem:[%s2513_s10 + $0x58] sm:$0xff] }
 0x744   : > { %1908 = vmatprep.subr.mxu0 %v2108_v8  ;;  %v1613_v61 = vld [vmem:[%s2513_s10 + $0x48] sm:$0xff] }
 0x746   : > { %1901 = vmatmul.mubr.msk.f32.vlgmr.msra.gmra.mxu0 %vm530_vm2, %v1006_v62  ;;  %v1612_v62 = vld [vmem:[%s2513_s10 + $0x40] sm:$0xff] }
 0x747   : > { %1910 = vmatprep.mubr.msk.f32.mxu0 %vm2109_vm1, %v2108_v8  ;;  %1909 = vmatpush3.msra.mxu0 %v419_v17  ;;  %v1604_v17 = vld [vmem:[%s2513_s10] sm:$0xff] }
 0x748   : > { %1918 = vmatprep.subr.mxu0 %v2108_v8 }
 0x802   : > { %v928_v63 = vpop.f32.mrf.mxu0 }
 0x803   : > { %v1002_v32 = vadd.f32 %v2314_v52, %v928_v63  ;;  %v1523_v52 = vld [vmem:[%s2511_s8 + $0x18] sm:$0xff] }
 0x804   : > { %v1892_v1 = vpop.f32.mrf.mxu0  ;;  %v1611_v63 = vld [vmem:[%s2513_s10 + $0x38] sm:$0xff] }
 0x805   : > { %v1610_v1 = vld [vmem:[%s2513_s10 + $0x30] sm:$0xff] }
 0x806   : > { %v1079_v2 = vpop.f32.mrf.mxu0 }
 0x807   : > { %v1083_v3 = vmul.f32 2.828427, %v1079_v2  ;;  %v1609_v2 = vld [vmem:[%s2513_s10 + $0x28] sm:$0xff] }
 0x808   : > { %v1902_v4 = vpop.f32.mrf.mxu0 }
 0x809   : > { %v1084_v5 = vsel %vm530_vm2, %v1083_v3, -inf  ;;  %v1607_v4 = vld [vmem:[%s2513_s10 + $0x18] sm:$0xff] }
 0x80a   : > { %1085 = vmax.xlane.f32.xlu1 %v1084_v5 }
 0x893   : > { %v1086_v6 = vpop.xlane.xlu1 %1085 }
 0x894   : > { %v1087_v7 = vsub.f32 %v1083_v3, %v1086_v6  ;;  %v1608_v3 = vld [vmem:[%s2513_s10 + $0x20] sm:$0xff] }
 0x896   : > { %v1088_v9 = vmul.f32 1.442695, %v1087_v7 }
 0x898   : > { %2036 = vpow2.f32 %v1088_v9 }
 0x8a5   : > { %v2037_v10 = vpop.eup %2036 }
 0x8a6   : > { %v1090_v11 = vsel %vm530_vm2, %v2037_v10, 0.0 }
 0x8a7   : > { %1091 = vadd.xlane.f32.xlu0 %v1090_v11 }
 0x8bd   : > { %1247 = vrot.lane.b32.xlu0 %v2277_v21, %s2118_s17 }
 0x8c1   : > { %1245 = vrot.lane.b32.xlu0 %v2277_v21, %s2119_s18  ;;  %s402_s18 = sand.u32 1, %s2098_s22  }
 0x8c2   : > { %s1775_s19 = sshll.u32 %s402_s18, 3  ;;  %s1699_s1 = scalar_lea.sflag [#allocation3], %s402_s18 }
 0x8c3   : > { %s404_s29 = scalar_lea.vmem [#allocation2], %s1775_s19  ;;  %s2050_s19 = sshll.u32 %s2121_s25, 4  ;;  %s2051_s19 = int_to_ptr.vmem [resolvable:$false] %s2050_s19 }
 0x8c4   : > { %s1712_s15 = sshll.u32 %s404_s29, 4  ;;  %s2052_s20 = scalar_lea.vmem %s2051_s19, 256  ;;  %s1713_s15 = int_to_ptr.vmem [resolvable:$true] %s1712_s15 }
 0x8c5   : > { %s2046_s2 = scalar_lea.vmem %s1713_s15, 128  ;;  %p2053_p0 = scmp.lt.s32.totalorder %s1713_s15, %s2051_s19 }
 0x8c6   : > { %p2047_p11 = scmp.ne.s32.totalorder %s1713_s15, %s2046_s2  ;;  %p2054_p1 = scmp.lt.s32.totalorder %s2052_s20, %s2046_s2 }
 0x8c8   : > { %p2048_p12 = pnand %p2047_p11, %p2225_p5  ;;  %p2055_p2 = por %p2054_p1, %p2053_p0 }
 0x8ca   : > { %p2049_p13 = pneg %p2048_p12 }
 0x8cc   : > { %p2056_p3 = pnand %p2055_p2, %p2049_p13 }
 0x930   : > { %v1092_v12 = vpop.xlane.xlu0 %1091 }
 0x931   : > { %2038 = vrcp.f32 %v1092_v12  ;;  %v1798_v12 = vld [vmem:[%s2510_s7] ss:$0 sm:$0xff] }
 0x934   : > { %v1248_v14 = vpop.permute.xlu0 %1247 }
 0x938   : > { %v1246_v16 = vpop.permute.xlu0 %1245 }
 0x93e   : > { %v2039_v13 = vpop.eup %2038 }
 0x93f   : > { %v1094_v15 = vmul.f32 %v2039_v13, %v2037_v10  ;;  %v1797_v10 = vld [vmem:[%s2509_s6] ss:$0 sm:$0xff] }
 0x941   : > { %1906 = vmatmul.mubr.msk.f32.vlgmr.msra.gmra.mxu1 %vm530_vm2, %v1094_v15  ;;  %v1606_v15 = vld [vmem:[%s2513_s10 + $0x10] sm:$0xff] }
 0x942   : > { %1914 = vmatpush3.xpose.msk.msra.mxu1 %vm530_vm2, %v1248_v14  ;;  %1915 = vmatprep.mubr.msk.f32.mxu1 %vm2109_vm1, %v2108_v8 }
 0x943   : > { %1923 = vmatprep.subr.mxu1 %v2108_v8 }
 0x945   : > { %1916 = vmatmul.mubr.msk.f32.vlgmr.msra.gmra.mxu1 %vm530_vm2, %v1246_v16  ;;  %v1605_v16 = vld [vmem:[%s2513_s10 + $0x8] sm:$0xff] }
 0x946   : > { %1925 = vmatprep.mubr.msk.f32.mxu1 %vm2109_vm1, %v2108_v8  ;;  %1924 = vmatpush3.msra.mxu1 %v420_v31 }
 0x947   : > { %1939 = vmatprep.subr.mxu1 %v2108_v8 }
 0xa01   : > { %v1167_v18 = vpop.f32.mrf.mxu1 }
 0xa02   : > { %1911 = vmatmul.mubr.msk.f32.vlgmr.msra.gmra.mxu0 %vm530_vm2, %v1167_v18  ;;  %v1799_v18 = vld [vmem:[%s2512_s9] ss:$0 sm:$0xff] }
 0xa03   : > { %v1907_v19 = vpop.f32.mrf.mxu1  ;;  %1920 = vmatprep.mubr.msk.f32.mxu0 %vm2109_vm1, %v2108_v8 }
 0xa05   : > { %v1319_v20 = vpop.f32.mrf.mxu1 }
 0xa06   : > { %v1323_v22 = vmul.f32 2.828427, %v1319_v20 }
 0xa07   : > { %v1917_v23 = vpop.f32.mrf.mxu1 }
 0xa08   : > { %v1324_v24 = vsel %vm530_vm2, %v1323_v22, -inf }
 0xa09   : > { %1325 = vmax.xlane.f32.xlu1 %v1324_v24  ;;  %v1801_v24 = vld [vmem:[%s2514_s11] ss:$0 sm:$0xff] }
 0xa1a   : > { %1335 = vrot.lane.b32.xlu1 %v2277_v21, %s2120_s26 }
 0xa92   : > { %v1326_v25 = vpop.xlane.xlu1 %1325 }
 0xa93   : > { %v1327_v26 = vsub.f32 %v1323_v22, %v1326_v25 }
 0xa95   : > { %v1328_v27 = vmul.f32 1.442695, %v1327_v26 }
 0xa96   : > { %v1336_v28 = vpop.permute.xlu1 %1335 }
 0xa97   : > { %2040 = vpow2.f32 %v1328_v27  ;;  %1919 = vmatpush3.msra.mxu0 %v1336_v28 }
 0xa98   : > { %1928 = vmatprep.subr.mxu0 %v2108_v8 }
 0xaa4   : > { %v2041_v29 = vpop.eup %2040 }
 0xaa5   : > { %v1330_v30 = vsel %vm530_vm2, %v2041_v29, 0.0 }
 0xaa6   : > { %1331 = vadd.xlane.f32.xlu0 %v1330_v30 }
 0xac2   : > { %v1240_v21 = vpop.f32.mrf.mxu0 }
 0xac3   : > { %v1244_v33 = vadd.f32 %v1240_v21, %v1002_v32 }
 0xac4   : > { %v1912_v34 = vpop.f32.mrf.mxu0 }
 0xb2f   : > { %v1332_v35 = vpop.xlane.xlu0 %1331 }
 0xb30   : > { %2042 = vrcp.f32 %v1332_v35 }
 0xb3d   : > { %v2043_v36 = vpop.eup %2042 }
 0xb3e   : > { %v1334_v37 = vmul.f32 %v2043_v36, %v2041_v29 }
 0xb40   : > { %1921 = vmatmul.mubr.msk.f32.vlgmr.msra.gmra.mxu0 %vm530_vm2, %v1334_v37 }
 0xb41   : > { %1936 = vmatprep.mubr.msk.f32.mxu0 %vm2109_vm1, %v2108_v8  ;;  %1929 = vmatpush3.msra.mxu0 %v1523_v52 }
 0xb42   : > { %1930 = vmatprep.subr.mxu0 %v2108_v8 }
 0xc00   : > { %v1407_v38 = vpop.f32.mrf.mxu0 }
 0xc01   : > { %1926 = vmatmul.mubr.msk.f32.vlgmr.msra.gmra.mxu1 %vm530_vm2, %v1407_v38 }
 0xc02   : > { %v1922_v39 = vpop.f32.mrf.mxu0  ;;  %1971 = vmatprep.mubr.msk.f32.mxu1 %vm2109_vm1, %v2108_v8  ;;  %1940 = vmatpush3.msra.mxu1 %v1619_v55 }
 0xc03   : > { %1941 = vmatprep.subr.mxu1 %v2108_v8 }
 0xc04   : > { %1942 = vmatpush3.msra.mxu1 %v1618_v56 }
 0xc05   : > { %1943 = vmatprep.subr.mxu1 %v2108_v8 }
 0xc06   : > { %1944 = vmatpush3.msra.mxu1 %v1617_v57 }
 0xc07   : > { %1945 = vmatprep.subr.mxu1 %v2108_v8 }
 0xc08   : > { %1946 = vmatpush3.msra.mxu1 %v1616_v58 }
 0xc09   : > { %1947 = vmatprep.subr.mxu1 %v2108_v8 }
 0xc0a   : > { %1948 = vmatpush3.msra.mxu1 %v1615_v59 }
 0xc0b   : > { %1949 = vmatprep.subr.mxu1 %v2108_v8 }
 0xc0c   : > { %1950 = vmatpush3.msra.mxu1 %v1614_v60 }
 0xc0d   : > { %1951 = vmatprep.subr.mxu1 %v2108_v8 }
 0xc0e   : > { %1952 = vmatpush3.msra.mxu1 %v1613_v61 }
 0xc0f   : > { %1953 = vmatprep.subr.mxu1 %v2108_v8 }
 0xc10   : > { %1954 = vmatpush3.msra.mxu1 %v1612_v62 }
 0xc11   : > { %1955 = vmatprep.subr.mxu1 %v2108_v8 }
 0xc12   : > { %1956 = vmatpush3.msra.mxu1 %v1611_v63 }
 0xc13   : > { %1957 = vmatprep.subr.mxu1 %v2108_v8 }
 0xc14   : > { %1958 = vmatpush3.msra.mxu1 %v1610_v1 }
 0xc15   : > { %1959 = vmatprep.subr.mxu1 %v2108_v8 }
 0xc16   : > { %1960 = vmatpush3.msra.mxu1 %v1609_v2 }
 0xc17   : > { %1961 = vmatprep.subr.mxu1 %v2108_v8 }
 0xc18   : > { %1962 = vmatpush3.msra.mxu1 %v1608_v3 }
 0xc19   : > { %1963 = vmatprep.subr.mxu1 %v2108_v8 }
 0xc1a   : > { %1964 = vmatpush3.msra.mxu1 %v1607_v4 }
 0xc1b   : > { %1965 = vmatprep.subr.mxu1 %v2108_v8 }
 0xc1c   : > { %1966 = vmatpush3.msra.mxu1 %v1606_v15 }
 0xc1d   : > { %1967 = vmatprep.subr.mxu1 %v2108_v8 }
 0xc1e   : > { %1968 = vmatpush3.msra.mxu1 %v1605_v16 }
 0xc1f   : > { %1969 = vmatprep.subr.mxu1 %v2108_v8 }
 0xc20   : > { %1970 = vmatpush3.msra.mxu1 %v1604_v17 }
 0xcc1   : > { %v1480_v41 = vpop.f32.mrf.mxu1 }
 0xcc2   : > { %v1484_v42 = vadd.f32 %v1480_v41, %v1244_v33 }
 0xcc3   : > { %v1927_v43 = vpop.f32.mrf.mxu1 }
 0xcc4   : > { %v1491_v44 = vadd.f32 %v1796_v40, %v1484_v42 }
 0xcc6   : > { %v2370_v45 = vadd.f32 %v1491_v44, %v2240_v0  ;;  %v1522_v0 = vld [vmem:[%s2511_s8 + $0x10] sm:$0xff] }
 0xcc7   : > { %1931 = vmatpush3.msra.mxu0 %v1522_v0 }
 0xcc8   : > { %v1493_v46 = vsel %vm421_vm0, %v2370_v45, 0.0  ;;  %1932 = vmatprep.subr.mxu0 %v2108_v8 }
 0xcc9   : > { %1494 = vadd.xlane.f32.xlu1 %v1493_v46  ;;  %1933 = vmatpush3.msra.mxu0 %v1521_v53 }
 0xcca   : > { %1934 = vmatprep.subr.mxu0 %v2108_v8 }
 0xccb   : > { %1935 = vmatpush3.msra.mxu0 %v1520_v54 }
 0xd52   : > { %v1495_v47 = vpop.xlane.xlu1 %1494 }
 0xd53   : > { %v1496_v48 = vmul.f32 0.03125, %v1495_v47 }
 0xd55   : > { %v1497_v49 = vsub.f32 %v2370_v45, %v1496_v48 }
 0xd57   : > { %v1498_v50 = vmul.f32 %v1497_v49, %v1497_v49 }
 0xd59   : > { %v1499_v51 = vsel %vm421_vm0, %v1498_v50, 0.0 }
 0xd5a   : > { %1500 = vadd.xlane.f32.xlu0 %v1499_v51 }
 0xde3   : > { %v1501_v5 = vpop.xlane.xlu0 %1500 }
 0xde4   : > { %v1502_v6 = vmul.f32 0.03125, %v1501_v5 }
 0xde6   : > { %v1503_v7 = vadd.f32 1e-05, %v1502_v6 }
 0xde8   : > { %2044 = vrsqrt.f32 %v1503_v7 }
 0xdf5   : > { %v2045_v9 = vpop.eup %2044 }
 0xdf6   : > { %v1505_v11 = vmul.f32 %v2045_v9, %v1497_v49 }
 0xdf8   : > { %v1512_v13 = vmul.f32 %v1797_v10, %v1505_v11 }
 0xdfa   : > { %v1519_v14 = vadd.f32 %v1798_v12, %v1512_v13 }
 0xdfc   : > { %1937 = vmatmul.mubr.msk.f32.vlgmr.msra.gmra.mxu0 %vm421_vm0, %v1519_v14 }
 0xebc   : > { %v1599_v19 = vpop.f32.mrf.mxu0 }
 0xebd   : > { %v1600_v20 = vadd.f32 %v1799_v18, %v1599_v19 }
 0xebe   : > { %v1938_v22 = vpop.f32.mrf.mxu0 }
 0xebf   : > { %v1603_v23 = vmax.f32 %v1600_v20, 0.0 }
 0xec1   : > { %1972 = vmatmul.mubr.f32.vlgmr.msra.gmra.mxu1 %v1603_v23 }
 0xf81   : > { %v1692_v25 = vpop.f32.mrf.mxu1 }
 0xf82   : > { %v1693_v8 = vadd.f32 %v1801_v24, %v1692_v25 }
 0xf83   : > { %v1973_v26 = vpop.f32.mrf.mxu1 }
 0xf84   : > { %v1696_v27 = vadd.f32 %v1693_v8, %v2370_v45 }
 0xf86   : > { %1697 = vst.msk [vmem:[%s404_s29] sm:$0xff] %vm421_vm0, %v1696_v27 }
 0xf87   : > { %2059 = shalt.err (!%p2056_p3)
}
 0xf88   : > { %s2060_s26 = scalar_lea.hbm %s1710_s0, 128  ;;  %s2064_s29 = scalar_lea.hbm %s2515_s12, 256 }
 0xf89   : > { %p2061_p4 = scmp.ne.s32.totalorder %s1710_s0, %s2060_s26  ;;  %p2065_p9 = scmp.lt.s32.totalorder %s1710_s0, %s2515_s12 }
 0xf8a   : > { %p2066_p10 = scmp.lt.s32.totalorder %s2064_s29, %s2060_s26 }
 0xf8b   : > { %p2062_p7 = pnand %p2061_p4, %p2225_p5 }
 0xf8c   : > { %p2067_p11 = por %p2066_p10, %p2065_p9 }
 0xf8d   : > { %p2063_p8 = pneg %p2062_p7 }
 0xf8f   : > { %p2068_p12 = pnand %p2067_p11, %p2063_p8 }
 0xf91   : > { %2071 = shalt.err (!%p2068_p12)
}
 0xf92   : > { %1974 = dma.vmem_to_hbm [thread:$0]  (%p2225_p5), %s1713_s15, 128, %s1710_s0, %s1699_s1  }
 0xf93 PF: > { %p1980_p13 = scmp.ge.s32.totalorder %s2106_s24, 2  ;;  %s1724_s2 = sand.u32 1, %s2094_s21  }
 0xf94   : > { %s1725_s25 = scalar_lea.sflag [#allocation3], %s1724_s2 }
 0xf95   : > { %p1977_p0 = pnand %p1980_p13, %p2229_p6 }
 0xf97   : > { %p1978_p1 = pneg %p1977_p0 }
 0xf99   : > { %2089 = dma.done.wait (%p1978_p1), %s1725_s25, 128  }
 0xf9a   : > { %2091 = vsyncadd (%p1978_p1), %s1725_s25, 4294967168  ;;  %p22_p2 = scmp.ge.s32.totalorder %s2212_s27, 4   ;;  %s2524_s21 = smov %s2098_s22 }
 0xf9b   : > { %s2525_s22 = smov %s2102_s23  ;;  %s2526_s23 = smov %s2223_s30 }
 0xf9c   : > { %s2527_s24 = smov %s2212_s27  ;;  %24 = sbr.rel (!%p22_p2) target bundleno = 7 (0x7), region = 103 }
 0xfa1   :  { %1730 = vsyncpa [#allocation3], 1 }
 0xfa2   :  { %1732 = vsyncpa [#allocation3 + $0x1], 1 }

</bundles_post_ra>
